<compile_context>
chip_gen: v5e
topology: v5e:2x2
jax: 0.10.0
libtpu: 0.0.40
codegen_flags: <defaults>
</compile_context>

<pallas_src>
import functools

import jax
import jax.numpy as jnp
from jax.experimental import pallas as pl
from jax.experimental.pallas import tpu as pltpu


def _ln_affine_kernel(x_ref, g_ref, b_ref, o_ref, *, eps):
    # x_ref block: (Bn, CHW) -- Bn samples per grid step, each row normalized
    # independently over its full (C*H*W) extent.
    x = x_ref[...].astype(jnp.float32)
    mean = jnp.mean(x, axis=1, keepdims=True)            # (Bn, 1)
    xc = x - mean
    var = jnp.mean(xc * xc, axis=1, keepdims=True)       # biased variance (torch layer_norm)
    inv = jax.lax.rsqrt(var + eps)
    # g/b are (1, CHW); broadcast along the sample (sublane) axis is free VPU work.
    y = (xc * inv) * g_ref[...].astype(jnp.float32) + b_ref[...].astype(jnp.float32)
    o_ref[...] = y.astype(o_ref.dtype)


def _ln_kernel(x_ref, o_ref, *, eps):
    x = x_ref[...].astype(jnp.float32)
    mean = jnp.mean(x, axis=1, keepdims=True)
    xc = x - mean
    var = jnp.mean(xc * xc, axis=1, keepdims=True)
    inv = jax.lax.rsqrt(var + eps)
    o_ref[...] = (xc * inv).astype(o_ref.dtype)


def _choose_block_rows(N, CHW, *, target_block_bytes=2 << 20, min_grid_steps=4):
    """Samples per block.

    - Fill roughly `target_block_bytes` of f32 per input block (big DMAs; amortizes
      the ~0.35 us per-grid-step overhead).  2 MiB per block keeps
      2x(in)+2x(out)+f32 temps comfortably under a 32 MiB scoped-VMEM limit on
      every generation (incl. v7x's 64 MiB physical VMEM).
    - Keep >= min_grid_steps grid steps when N allows it (megacore sharding on
      v7x's two TensorCores, pipelining), but never drop below 8 sublane-dense
      rows per block.
    """
    rows_by_vmem = max(1, target_block_bytes // (CHW * 4))
    rows_by_grid = max(1, -(-N // min_grid_steps))        # ceil(N / min_grid_steps)
    bn = min(N, rows_by_vmem, max(rows_by_grid, min(8, N)))
    if bn < N and bn >= 8:
        bn = (bn // 8) * 8                                # sublane-aligned block rows
    return bn


def layer_norm(x, weight=None, bias=None, *, eps=1e-5, affine=True):
    """x: (N, C, H, W). weight/bias: (C, 1, 1) as in the PyTorch module."""
    N, C, H, W = x.shape
    HW = H * W
    CHW = C * HW

    # TODO(synk): if a single sample (CHW*4 bytes) ever exceeds the per-block VMEM
    # budget, switch to a two-pass chunked sum / sum-of-squares reduction over an
    # inner "arbitrary" grid axis (accumulate into VMEM scratch, normalize second pass).

    x2 = x.reshape(N, CHW)                                # lane-dense per-sample rows

    bn = _choose_block_rows(N, CHW)
    grid = (pl.cdiv(N, bn),)

    x_spec = pl.BlockSpec((bn, CHW), lambda i: (i, 0))
    out_spec = pl.BlockSpec((bn, CHW), lambda i: (i, 0))
    out_shape = jax.ShapeDtypeStruct((N, CHW), x.dtype)

    compiler_params = pltpu.CompilerParams(
        dimension_semantics=("parallel",),
        vmem_limit_bytes=32 * 1024 * 1024,
    )

    if affine:
        # Tiny (1, CHW) gain/bias vectors (C*H*W elements, a few KiB): per-channel
        # params repeated over the spatial extent.  Constant index_map -> fetched
        # once and reused across all grid steps.
        g_vec = jnp.broadcast_to(weight.reshape(C, 1), (C, HW)).reshape(1, CHW)
        b_vec = jnp.broadcast_to(bias.reshape(C, 1), (C, HW)).reshape(1, CHW)
        p_spec = pl.BlockSpec((1, CHW), lambda i: (0, 0))

        out = pl.pallas_call(
            functools.partial(_ln_affine_kernel, eps=eps),
            out_shape=out_shape,
            grid=grid,
            in_specs=[x_spec, p_spec, p_spec],
            out_specs=out_spec,
            compiler_params=compiler_params,
        )(x2, g_vec, b_vec)
    else:
        out = pl.pallas_call(
            functools.partial(_ln_kernel, eps=eps),
            out_shape=out_shape,
            grid=grid,
            in_specs=[x_spec],
            out_specs=out_spec,
            compiler_params=compiler_params,
        )(x2)

    return out.reshape(N, C, H, W)


def _reference_layer_norm(x, weight, bias, eps=1e-5):
    # Pure-JAX reference matching F.layer_norm over dims (1,2,3) with per-channel affine.
    x32 = x.astype(jnp.float32)
    mean = jnp.mean(x32, axis=(1, 2, 3), keepdims=True)
    var = jnp.mean((x32 - mean) ** 2, axis=(1, 2, 3), keepdims=True)
    y = (x32 - mean) * jax.lax.rsqrt(var + eps)
    C = x.shape[1]
    g = weight.reshape(1, C, 1, 1)
    b = bias.reshape(1, C, 1, 1)
    return (y * g + b).astype(x.dtype)


if __name__ == "__main__":
    key = jax.random.PRNGKey(0)
    N, C, H, W = 2, 4, 16, 16

    kx, kw, kb = jax.random.split(key, 3)
    x = jax.random.normal(kx, (N, C, H, W), dtype=jnp.float32)

    # Deterministic parameter init per nn.Module.__init__: ones / zeros, shape (C, 1, 1).
    weight = jnp.ones((C, 1, 1), dtype=jnp.float32)
    bias = jnp.zeros((C, 1, 1), dtype=jnp.float32)

    out = jax.block_until_ready(layer_norm(x, weight, bias, eps=1e-5, affine=True))
    ref = _reference_layer_norm(x, weight, bias, eps=1e-5)
    assert out.shape == (N, C, H, W)
    assert jnp.allclose(out, ref, atol=1e-5, rtol=1e-5), "affine mismatch vs reference"

    # Extra check: non-trivial per-channel affine (exercises the flattened gain layout).
    w2 = jax.random.normal(kw, (C, 1, 1), dtype=jnp.float32)
    b2 = jax.random.normal(kb, (C, 1, 1), dtype=jnp.float32)
    out2 = jax.block_until_ready(layer_norm(x, w2, b2, eps=1e-5, affine=True))
    ref2 = _reference_layer_norm(x, w2, b2, eps=1e-5)
    assert jnp.allclose(out2, ref2, atol=1e-5, rtol=1e-5), "affine(random) mismatch"

    # Non-affine path.
    out3 = jax.block_until_ready(layer_norm(x, eps=1e-5, affine=False))
    ref3 = _reference_layer_norm(x, jnp.ones((C, 1, 1), jnp.float32),
                                 jnp.zeros((C, 1, 1), jnp.float32), eps=1e-5)
    assert jnp.allclose(out3, ref3, atol=1e-5, rtol=1e-5), "no-affine mismatch"

    print("KERNEL_OK")
</pallas_src>

<mosaic_0001>
module attributes {stable_mosaic.version = 11 : i64} {
  func.func @_ln_affine_kernel(%arg0: i32, %arg1: memref<2x1024xf32, #tpu.memory_space<vmem>>, %arg2: memref<1x1024xf32, #tpu.memory_space<vmem>>, %arg3: memref<1x1024xf32, #tpu.memory_space<vmem>>, %arg4: memref<2x1024xf32, #tpu.memory_space<vmem>>) attributes {dimension_semantics = [#tpu.dimension_semantics<parallel>], iteration_bounds = array<i64: 1>, scalar_prefetch = 0 : i64, scratch_operands = 0 : i64, tpu.core_type = #tpu.core_type<tc>, window_params = [{transform_indices = @transform_0, window_bounds = array<i64: 2, 1024>}, {pipeline_mode = #tpu.pipeline_mode<synchronous>, transform_indices = @transform_1, window_bounds = array<i64: 1, 1024>}, {pipeline_mode = #tpu.pipeline_mode<synchronous>, transform_indices = @transform_2, window_bounds = array<i64: 1, 1024>}, {transform_indices = @transform_3, window_bounds = array<i64: 2, 1024>}]} {
    %c0 = arith.constant 0 : index
    %c0_0 = arith.constant 0 : index
    %0 = vector.load %arg1[%c0, %c0_0] : memref<2x1024xf32, #tpu.memory_space<vmem>>, vector<2x1024xf32>
    %cst = arith.constant dense<0.000000e+00> : vector<2xf32>
    %1 = vector.multi_reduction <add>, %0, %cst [1] : vector<2x1024xf32> to vector<2xf32>
    %2 = vector.shape_cast %1 : vector<2xf32> to vector<2x1xf32>
    %cst_1 = arith.constant 1.024000e+03 : f32
    %3 = vector.broadcast %cst_1 : f32 to vector<2x1xf32>
    %4 = arith.divf %2, %3 : vector<2x1xf32>
    %5 = vector.broadcast %4 : vector<2x1xf32> to vector<2x1024xf32>
    %6 = arith.subf %0, %5 : vector<2x1024xf32>
    %7 = arith.mulf %6, %6 : vector<2x1024xf32>
    %cst_2 = arith.constant dense<0.000000e+00> : vector<2xf32>
    %8 = vector.multi_reduction <add>, %7, %cst_2 [1] : vector<2x1024xf32> to vector<2xf32>
    %9 = vector.shape_cast %8 : vector<2xf32> to vector<2x1xf32>
    %cst_3 = arith.constant 1.024000e+03 : f32
    %10 = vector.broadcast %cst_3 : f32 to vector<2x1xf32>
    %11 = arith.divf %9, %10 : vector<2x1xf32>
    %cst_4 = arith.constant 9.99999974E-6 : f32
    %12 = vector.broadcast %cst_4 : f32 to vector<2x1xf32>
    %13 = arith.addf %11, %12 : vector<2x1xf32>
    %14 = math.rsqrt %13 : vector<2x1xf32>
    %15 = vector.broadcast %14 : vector<2x1xf32> to vector<2x1024xf32>
    %16 = arith.mulf %6, %15 : vector<2x1024xf32>
    %c0_5 = arith.constant 0 : index
    %c0_6 = arith.constant 0 : index
    %17 = vector.load %arg2[%c0_5, %c0_6] : memref<1x1024xf32, #tpu.memory_space<vmem>>, vector<1x1024xf32>
    %18 = vector.broadcast %17 : vector<1x1024xf32> to vector<2x1024xf32>
    %19 = arith.mulf %16, %18 : vector<2x1024xf32>
    %c0_7 = arith.constant 0 : index
    %c0_8 = arith.constant 0 : index
    %20 = vector.load %arg3[%c0_7, %c0_8] : memref<1x1024xf32, #tpu.memory_space<vmem>>, vector<1x1024xf32>
    %21 = vector.broadcast %20 : vector<1x1024xf32> to vector<2x1024xf32>
    %22 = arith.addf %19, %21 : vector<2x1024xf32>
    %c0_9 = arith.constant 0 : index
    %c0_10 = arith.constant 0 : index
    %23 = vector.load %arg4[%c0_9, %c0_10] : memref<2x1024xf32, #tpu.memory_space<vmem>>, vector<2x1024xf32>
    tpu.vector_store %arg4[%c0_9, %c0_10], %22 {strides = array<i32>} : memref<2x1024xf32, #tpu.memory_space<vmem>>, vector<2x1024xf32>,
    return
  }
  func.func @transform_0(%arg0: i32) -> (i32, i32) {
    %c0_i32 = arith.constant 0 : i32
    %c0_i32_0 = arith.constant 0 : i32
    return %arg0, %c0_i32 : i32, i32
  }
  func.func @transform_1(%arg0: i32) -> (i32, i32) {
    %c0_i32 = arith.constant 0 : i32
    %c0_i32_0 = arith.constant 0 : i32
    %c0_i32_1 = arith.constant 0 : i32
    return %c0_i32, %c0_i32_0 : i32, i32
  }
  func.func @transform_2(%arg0: i32) -> (i32, i32) {
    %c0_i32 = arith.constant 0 : i32
    %c0_i32_0 = arith.constant 0 : i32
    %c0_i32_1 = arith.constant 0 : i32
    return %c0_i32, %c0_i32_0 : i32, i32
  }
  func.func @transform_3(%arg0: i32) -> (i32, i32) {
    %c0_i32 = arith.constant 0 : i32
    %c0_i32_0 = arith.constant 0 : i32
    return %arg0, %c0_i32 : i32, i32
  }
}

</mosaic_0001>

<bundles_post_ra>
// kernel: tpu_custom_call.1
= control target key start
LH: loop header
LB: loop body
LE: loop exit
PB: predicated region body
PF: predicated region fallthrough
CT: control target
= control target key end

     0   :  { %8 = vsyncpa [#allocation3], 0  ;;  %s438_s0 = inlined_call_operand.hbm [shape: f32[2,1024], index: 0, kind: input, shape index: {}]   ;;  %s439_s1 = inlined_call_operand.hbm [shape: f32[1,1024], index: 1, kind: input, shape index: {}]   ;;  %s440_s2 = inlined_call_operand.hbm [shape: f32[1,1024], index: 2, kind: input, shape index: {}]   ;;  %s441_s3 = inlined_call_operand.hbm [shape: f32[2,1024], index: 3, kind: output, shape index: {}]  }
   0x1   :  { %9 = vsyncpa [#allocation6], 0  ;;  %s27_s14 = sshll.u32 %s439_s1, 4  ;;  %s28_s14 = int_to_ptr.hbm [resolvable:$true] %s27_s14 }
   0x2   :  { %10 = vsyncpa [#allocation4], 0  ;;  %s359_s15 = smov [#allocation5]   ;;  %s16_s19 = sshll.u32 %s438_s0, 4  ;;  %s17_s19 = int_to_ptr.hbm [resolvable:$true] %s16_s19 }
   0x3   :  { %s29_s16 = sshll.u32 %s359_s15, 4  ;;  %s360_s20 = smov [#allocation2]   ;;  %s30_s16 = int_to_ptr.vmem [resolvable:$true] %s29_s16 }
   0x4   :  { %32 = dma.hbm_to_vmem [thread:$0]  %s28_s14, 128, %s30_s16, [#allocation6]  }
   0x5   :  { %s18_s21 = sshll.u32 %s360_s20, 4  ;;  %s38_s24 = sshll.u32 %s440_s2, 4  ;;  %s19_s21 = int_to_ptr.vmem [resolvable:$true] %s18_s21  ;;  %s39_s24 = int_to_ptr.hbm [resolvable:$true] %s38_s24 }
   0x6   :  { %21 = dma.hbm_to_vmem [thread:$0]  %s17_s19, 256, %s19_s21, [#allocation3]  }
   0x7   :  { %s361_s1 = smov [#allocation7]  }
   0x8   :  { %s40_s25 = sshll.u32 %s361_s1, 4  ;;  %s41_s25 = int_to_ptr.vmem [resolvable:$true] %s40_s25 }
   0x9   :  { %43 = dma.hbm_to_vmem [thread:$0]  %s39_s24, 128, %s41_s25, [#allocation6]  }
   0xa   :  { %353 = dma.done.wait [#allocation3], 256  }
   0xb   :  { %354 = vsyncadd [#allocation3], 4294967040 }
   0xc   :  { %355 = dma.done.wait [#allocation6], 256  }
   0xd   :  { %356 = vsyncadd [#allocation6], 4294967040  ;;  %v56_v0 = vld [vmem:[#allocation2] sm:$0xff]  ;;  %v57_v1 = vld [vmem:[#allocation2 + $0x8] sm:$0xff]  ;;  %vm79_vm0 = vcmask 1041408   ;;  %v362_v25 = vmov 1024.0  }
   0xe   :  { %60 = vst [vmem:[#allocation1] ss:$4 sm:$0xff] %v56_v0  ;;  %253 = vrcp.f32 %v362_v25  ;;  %v363_v31 = vmov 269488144   ;;  %vm190_vm2 = vcmask 1045508   ;;  %vm192_vm6 = vcmask 1043456  }
   0xf   :  { %62 = vst [vmem:[#allocation1 + $0x20] ss:$4 sm:$0xff] %v57_v1  ;;  %v402_v32 = vunpack.c.l.s4 %v363_v31  ;;  %s364_s0 = smov [#allocation8]   ;;  %s236_s28 = sshll.u32 %s441_s3, 4  ;;  %s237_s28 = int_to_ptr.hbm [resolvable:$true] %s236_s28 }
  0x10   :  { %s234_s2 = sshll.u32 %s364_s0, 4  ;;  %s235_s2 = int_to_ptr.vmem [resolvable:$true] %s234_s2 }
  0x11   :  { %v108_v34 = vunpack.c.0.s8 %v402_v32 }
  0x14   :  { %v254_v26 = vpop.eup %253 }
  0x15   :  { %v63_v2 = vld.sshfl [vmem:[#allocation1] sm:$0xff pattern:$0x73625140]  ;;  %v64_v3 = vld.sshfl [vmem:[#allocation1 + $0x8] sm:$0xff pattern:$0x73625140]  ;;  %vm102_vm1 = vweird.f32 %v254_v26 }
  0x16   :  { %v65_v4 = vld.sshfl [vmem:[#allocation1 + $0x10] sm:$0xff pattern:$0x73625140]  ;;  %v66_v5 = vld.sshfl [vmem:[#allocation1 + $0x18] sm:$0xff pattern:$0x73625140] }
  0x17   :  { %v80_v6 = vsel %vm79_vm0, %v63_v2, 0.0  ;;  %v81_v7 = vsel %vm79_vm0, %v64_v3, 0.0  ;;  %v83_v8 = vsel %vm79_vm0, %v65_v4, 0.0  ;;  %v67_v9 = vld.sshfl [vmem:[#allocation1 + $0x20] sm:$0xff pattern:$0x73625140] }
  0x18   :  { %v82_v10 = vadd.f32 %v81_v7, %v80_v6  ;;  %v85_v11 = vsel %vm79_vm0, %v66_v5, 0.0  ;;  %v68_v12 = vld.sshfl [vmem:[#allocation1 + $0x28] sm:$0xff pattern:$0x73625140]  ;;  %v87_v14 = vsel %vm79_vm0, %v67_v9, 0.0  ;;  %v98_v27 = vmul.f32 1024.0, %v254_v26 }
  0x19   :  { %v69_v15 = vld.sshfl [vmem:[#allocation1 + $0x30] sm:$0xff pattern:$0x73625140]  ;;  %v89_v17 = vsel %vm79_vm0, %v68_v12, 0.0  ;;  %v173_v4 = vld [vmem:[#allocation5] sm:$0xff] }
  0x1a   :  { %v84_v13 = vadd.f32 %v83_v8, %v82_v10  ;;  %v70_v18 = vld.sshfl [vmem:[#allocation1 + $0x38] sm:$0xff pattern:$0x73625140]  ;;  %v91_v20 = vsel %vm79_vm0, %v69_v15, 0.0  ;;  %v99_v28 = vsub.f32 1.0, %v98_v27  ;;  %v176_v5 = vperm.slane %v173_v4, 1 }
  0x1b   :  { %v93_v22 = vsel %vm79_vm0, %v70_v18, 0.0  ;;  %v177_v6 = vperm.slane %v173_v4, 2  ;;  %v201_v8 = vld [vmem:[#allocation7] sm:$0xff]  ;;  %v178_v10 = vperm.slane %v173_v4, 3  ;;  %v181_v12 = vperm.slane %v173_v4, 6 }
  0x1c   :  { %v86_v16 = vadd.f32 %v85_v11, %v84_v13  ;;  %v100_v29 = vmul.f32 %v254_v26, %v99_v28  ;;  %v180_v11 = vperm.slane %v173_v4, 5  ;;  %v175_v13 = vperm.slane %v173_v4, 0 }
  0x1d   :  { %v182_v15 = vperm.slane %v173_v4, 7  ;;  %v184_v18 = vrot.slane %v177_v6, 4  ;;  %v187_v28 = vrot.slane %v181_v12, 4  ;;  %v207_v31 = vperm.slane %v201_v8, 4 }
  0x1e   :  { %v88_v19 = vadd.f32 %v87_v14, %v86_v16  ;;  %v101_v30 = vadd.f32 %v254_v26, %v100_v29  ;;  %v179_v14 = vperm.slane %v173_v4, 4  ;;  %v183_v16 = vrot.slane %v176_v5, 6 }
  0x1f   :  { %v186_v27 = vrot.slane %v180_v11, 6  ;;  %v188_v29 = vrot.slane %v182_v15, 2 }
  0x20   :  { %v90_v21 = vadd.f32 %v89_v17, %v88_v19  ;;  %v103_v33 = vsel %vm102_vm1, %v254_v26, %v101_v30  ;;  %v204_v19 = vperm.slane %v201_v8, 1  ;;  %v185_v26 = vrot.slane %v178_v10, 2 }
  0x21   :  { %v203_v30 = vperm.slane %v201_v8, 0 }
  0x22   :  { %v92_v23 = vadd.f32 %v91_v20, %v90_v21  ;;  %v205_v20 = vperm.slane %v201_v8, 2  ;;  %v206_v21 = vperm.slane %v201_v8, 3 }
  0x24   :  { %v94_v24 = vadd.f32 %v93_v22, %v92_v23  ;;  %v208_v22 = vperm.slane %v201_v8, 5  ;;  %v209_v23 = vperm.slane %v201_v8, 6 }
  0x26   :  { %95 = vadd.xlane.f32.xlu0 %v94_v24  ;;  %v210_v24 = vperm.slane %v201_v8, 7 }
  0x99   :  { %v96_v35 = vpop.xlane.xlu0 %95 }
  0x9a   :  { %v104_v36 = vmul.f32 %v103_v33, %v96_v35  ;;  %v211_v35 = vrot.slane %v204_v19, 6 }
  0x9c   :  { %v109_v37 = vperm.slane %v104_v36, %v108_v34  ;;  %v212_v36 = vrot.slane %v205_v20, 4 }
  0x9e   :  { %v407_v38 = vsub.f32 %v56_v0, %v109_v37  ;;  %v409_v39 = vsub.f32 %v57_v1, %v109_v37  ;;  %v213_v37 = vrot.slane %v206_v21, 2 }
  0xa0   :  { %v113_v40 = vmul.f32 %v407_v38, %v407_v38  ;;  %v114_v41 = vmul.f32 %v409_v39, %v409_v39 }
  0xa2   :  { %117 = vst [vmem:[#allocation1] ss:$4 sm:$0xff] %v113_v40  ;;  %v214_v40 = vrot.slane %v208_v22, 6 }
  0xa3   :  { %119 = vst [vmem:[#allocation1 + $0x20] ss:$4 sm:$0xff] %v114_v41  ;;  %v215_v41 = vrot.slane %v209_v23, 4 }
  0xa9   :  { %v120_v42 = vld.sshfl [vmem:[#allocation1] sm:$0xff pattern:$0x73625140]  ;;  %v121_v43 = vld.sshfl [vmem:[#allocation1 + $0x8] sm:$0xff pattern:$0x73625140] }
  0xaa   :  { %v122_v44 = vld.sshfl [vmem:[#allocation1 + $0x10] sm:$0xff pattern:$0x73625140]  ;;  %v136_v45 = vsel %vm79_vm0, %v120_v42, 0.0  ;;  %v137_v46 = vsel %vm79_vm0, %v121_v43, 0.0  ;;  %v216_v42 = vrot.slane %v210_v24, 2 }
  0xab   :  { %v123_v47 = vld.sshfl [vmem:[#allocation1 + $0x18] sm:$0xff pattern:$0x73625140]  ;;  %v138_v48 = vadd.f32 %v137_v46, %v136_v45  ;;  %v139_v49 = vsel %vm79_vm0, %v122_v44, 0.0  ;;  %v189_v44 = vsel %vm79_vm0, %v175_v13, %v183_v16  ;;  %v191_v45 = vsel %vm190_vm2, %v184_v18, %v185_v26 }
  0xac   :  { %v124_v50 = vld.sshfl [vmem:[#allocation1 + $0x20] sm:$0xff pattern:$0x73625140]  ;;  %v141_v52 = vsel %vm79_vm0, %v123_v47, 0.0  ;;  %v194_v46 = vsel %vm79_vm0, %v179_v14, %v186_v27  ;;  %v195_v47 = vsel %vm190_vm2, %v187_v28, %v188_v29 }
  0xad   :  { %v140_v51 = vadd.f32 %v139_v49, %v138_v48  ;;  %v125_v53 = vld.sshfl [vmem:[#allocation1 + $0x28] sm:$0xff pattern:$0x73625140]  ;;  %v143_v55 = vsel %vm79_vm0, %v124_v50, 0.0  ;;  %v217_v49 = vsel %vm79_vm0, %v203_v30, %v211_v35 }
  0xae   :  { %v126_v56 = vld.sshfl [vmem:[#allocation1 + $0x30] sm:$0xff pattern:$0x73625140]  ;;  %v145_v58 = vsel %vm79_vm0, %v125_v53, 0.0  ;;  %v221_v53 = vsel %vm190_vm2, %v215_v41, %v216_v42 }
  0xaf   :  { %v142_v54 = vadd.f32 %v141_v52, %v140_v51  ;;  %v127_v59 = vld.sshfl [vmem:[#allocation1 + $0x38] sm:$0xff pattern:$0x73625140]  ;;  %v147_v61 = vsel %vm79_vm0, %v126_v56, 0.0  ;;  %v218_v51 = vsel %vm190_vm2, %v212_v36, %v213_v37  ;;  %v220_v52 = vsel %vm79_vm0, %v207_v31, %v214_v40 }
  0xb0   :  { %v149_v63 = vsel %vm79_vm0, %v127_v59, 0.0  ;;  %v222_v59 = vsel %vm192_vm6, %v220_v52, %v221_v53 }
  0xb1   :  { %v144_v57 = vadd.f32 %v143_v55, %v142_v54  ;;  %v193_v54 = vsel %vm192_vm6, %v189_v44, %v191_v45  ;;  %v196_v55 = vsel %vm192_vm6, %v194_v46, %v195_v47 }
  0xb3   :  { %v146_v60 = vadd.f32 %v145_v58, %v144_v57  ;;  %v219_v58 = vsel %vm192_vm6, %v217_v49, %v218_v51 }
  0xb5   :  { %v148_v62 = vadd.f32 %v147_v61, %v146_v60 }
  0xb7   :  { %v150_v0 = vadd.f32 %v149_v63, %v148_v62 }
  0xb9   :  { %151 = vadd.xlane.f32.xlu0 %v150_v0 }
 0x12c   :  { %v152_v1 = vpop.xlane.xlu0 %151 }
 0x12d   :  { %v153_v2 = vmul.f32 %v152_v1, %v103_v33 }
 0x12f   :  { %v154_v3 = vadd.f32 1e-05, %v153_v2 }
 0x131   :  { %255 = vrsqrt.f32 %v154_v3  ;;  %vm161_vm4 = vweird.f32 %v154_v3 }
 0x137   :  { %v256_v7 = vpop.eup %255 }
 0x138   :  { %v156_v9 = vmul.f32 %v256_v7, %v154_v3  ;;  %vm162_vm3 = vweird.f32 %v256_v7 }
 0x139   :  { %vm163_vm5 = vmor %vm161_vm4, %vm162_vm3 }
 0x13a   :  { %v157_v17 = vmul.f32 %v256_v7, %v156_v9 }
 0x13c   :  { %v158_v25 = vmul.f32 0.5, %v157_v17 }
 0x13e   :  { %v159_v33 = vsub.f32 1.5, %v158_v25 }
 0x140   :  { %v160_v43 = vmul.f32 %v256_v7, %v159_v33 }
 0x142   :  { %v164_v48 = vsel %vm163_vm5, %v256_v7, %v160_v43 }
 0x143   :  { %v169_v50 = vperm.slane %v164_v48, %v108_v34 }
 0x145   :  { %v171_v56 = vmul.f32 %v169_v50, %v407_v38  ;;  %v172_v57 = vmul.f32 %v169_v50, %v409_v39 }
 0x147   :  { %v199_v60 = vmul.f32 %v193_v54, %v171_v56  ;;  %v200_v61 = vmul.f32 %v196_v55, %v172_v57 }
 0x149   :  { %v225_v32 = vadd.f32 %v219_v58, %v199_v60  ;;  %v226_v34 = vadd.f32 %v222_v59, %v200_v61 }
 0x14b   :  { %227 = vst [vmem:[#allocation8] sm:$0xff] %v225_v32 }
 0x14c   :  { %228 = vst [vmem:[#allocation8 + $0x8] sm:$0xff] %v226_v34 }
 0x14d   :  { %239 = dma.vmem_to_hbm [thread:$0]  %s235_s2, 256, %s237_s28, [#allocation4]  }
 0x14e   :  { %357 = dma.done.wait [#allocation4], 256  }
 0x14f   :  { %358 = vsyncadd [#allocation4], 4294967040 }
 0x150   :  { %244 = vsyncpa [#allocation3], 1 }
 0x151   :  { %245 = vsyncpa [#allocation6], 1 }
 0x152   :  { %246 = vsyncpa [#allocation4], 1 }

</bundles_post_ra>
